<compile_context>
chip_gen: v6e
topology: v6e:2x2x1
jax: 0.10.0
libtpu: 0.0.40
codegen_flags: <defaults>
</compile_context>

<pallas_src>
import numpy as np
import jax
import jax.numpy as jnp
from jax import lax
from jax.experimental import pallas as pl
from jax.experimental.pallas import tpu as pltpu


def _make_triplet_kernel(margin, n_neg):
    margin = float(margin)

    def kernel(xa_ref, xp_ref, xn_ref, out_ref):
        # xa_ref/xp_ref: (dim, tb); xn_ref: (n_neg, dim, tb); out_ref: (1, tb)
        xa = xa_ref[...].astype(jnp.float32)
        xp = xp_ref[...].astype(jnp.float32)
        d_ap = xa - xp
        dpos = jnp.sum(d_ap * d_ap, axis=0, keepdims=True)          # (1, tb)

        def body(j, acc):
            d_an = xa - xn_ref[j].astype(jnp.float32)                # (dim, tb)
            dneg = jnp.sum(d_an * d_an, axis=0, keepdims=True)       # (1, tb)
            return acc + jnp.maximum(dpos - dneg + margin, 0.0)

        out_ref[...] = lax.fori_loop(0, n_neg, body,
                                     jnp.zeros_like(dpos), unroll=True)

    return kernel


def triplet_loss_pallas(x, label, margin=0.1, *, staging_dtype=jnp.float32,
                        max_tile_tuples=4096):
    """x: (dim, N) array. label: length-N with -1 (anchor) / 1 (positive) / 0 (negative)."""
    label = np.asarray(label)
    x = jnp.asarray(x, dtype=jnp.float32)
    dim, N = x.shape

    a_idx = np.where(label == -1)[0]
    p_idx = np.where(label == 1)[0]
    n_idx = np.where(label == 0)[0]
    nq = int(a_idx.size)
    assert nq > 0 and N % nq == 0, "label must contain nq anchors with N = nq * S"
    S = N // nq
    assert p_idx.size == nq and n_idx.size == nq * (S - 2), "unexpected label layout"
    if S <= 2:                      # no negatives -> empty loss
        return jnp.float32(0.0)
    n_neg = S - 2
    n_idx = n_idx.reshape(nq, n_neg)

    staging_dtype = jnp.dtype(staging_dtype)
    itemsize = staging_dtype.itemsize

    # De-interleave once (single gather pass, no anchor duplication).
    xa = x[:, a_idx].astype(staging_dtype)                      # (dim, nq)
    xp = x[:, p_idx].astype(staging_dtype)                      # (dim, nq)
    xn = jnp.moveaxis(x[:, n_idx], -1, 0).astype(staging_dtype)  # (n_neg, dim, nq)

    # ---- generation-aware tile selection (lane-dense tuple blocks) ----
    try:
        vmem_cap = int(pltpu.get_tpu_info().vmem_capacity_bytes)
    except Exception:
        vmem_cap = 64 * 1024 * 1024          # conservative (v7x-sized) fallback
    vmem_budget = (vmem_cap * 3) // 4        # leave ~25% headroom for pipelining

    per_tuple_in_bytes = (2 + n_neg) * dim * itemsize            # xa + xp + all negs
    per_tuple_total = 2 * per_tuple_in_bytes + 2 * 4             # 2-deep bufs + f32 out
    if nq <= 128:
        tb = nq                              # full axis (no padding, tiny case)
    else:
        tb_cap = max(128, min(int(max_tile_tuples), vmem_budget // per_tuple_total))
        tb_cap = (tb_cap // 128) * 128
        tb = min(tb_cap, ((nq + 127) // 128) * 128)
    nq_pad = ((nq + tb - 1) // tb) * tb

    if nq_pad != nq:
        pad = nq_pad - nq
        xa = jnp.pad(xa, ((0, 0), (0, pad)))
        xp = jnp.pad(xp, ((0, 0), (0, pad)))
        xn = jnp.pad(xn, ((0, 0), (0, 0), (0, pad)))

    grid = (nq_pad // tb,)
    in_block_bytes = (2 + n_neg) * dim * tb * itemsize
    out_block_bytes = tb * 4
    vmem_limit = int(max(2 * (in_block_bytes + out_block_bytes) + (4 << 20), 16 << 20))
    vmem_limit = int(min(vmem_limit, vmem_budget))

    per_tuple_loss = pl.pallas_call(
        _make_triplet_kernel(margin, n_neg),
        out_shape=jax.ShapeDtypeStruct((1, nq_pad), jnp.float32),
        grid_spec=pltpu.PrefetchScalarGridSpec(
            num_scalar_prefetch=0,
            grid=grid,
            in_specs=[
                pl.BlockSpec((dim, tb), lambda i: (0, i)),          # anchors
                pl.BlockSpec((dim, tb), lambda i: (0, i)),          # positives
                pl.BlockSpec((n_neg, dim, tb), lambda i: (0, 0, i)),  # all negatives
            ],
            out_specs=pl.BlockSpec((1, tb), lambda i: (0, i)),
        ),
        compiler_params=pltpu.CompilerParams(
            dimension_semantics=("parallel",),
            vmem_limit_bytes=vmem_limit,
        ),
    )(xa, xp, xn)

    # Padded tuples are simply dropped here (no in-kernel mask needed).
    return jnp.sum(per_tuple_loss[0, :nq]) / nq


def triplet_loss_ref(x, label, margin=0.1):
    """Pure-JAX reference mirroring the PyTorch triplet_loss."""
    label = np.asarray(label)
    x = jnp.asarray(x, dtype=jnp.float32)
    dim, N = x.shape
    nq = int((label == -1).sum())
    S = N // nq
    a_idx = np.where(label == -1)[0]
    p_idx = np.where(label == 1)[0]
    n_idx = np.where(label == 0)[0]
    xa = x[:, np.repeat(a_idx, S - 2)]
    xp = x[:, np.repeat(p_idx, S - 2)]
    xn = x[:, n_idx]
    dist_pos = jnp.sum((xa - xp) ** 2, axis=0)
    dist_neg = jnp.sum((xa - xn) ** 2, axis=0)
    return jnp.sum(jnp.maximum(dist_pos - dist_neg + margin, 0.0)) / nq


if __name__ == "__main__":
    margin = 0.1

    # Small case consistent with the module: nq=4 tuples of S=5 columns
    # [anchor, positive, n1, n2, n3], feature dim=32 -> x (32, 20).
    dim, nq, S = 32, 4, 5
    label = np.array(([-1, 1] + [0] * (S - 2)) * nq, dtype=np.int64)
    x = jax.random.normal(jax.random.PRNGKey(0), (dim, nq * S), dtype=jnp.float32)

    out = jax.block_until_ready(triplet_loss_pallas(x, label, margin=margin))
    ref = jax.block_until_ready(triplet_loss_ref(x, label, margin=margin))
    assert np.allclose(np.asarray(out), np.asarray(ref), rtol=1e-4, atol=1e-3), (out, ref)

    # Larger case exercising the tiled / padded multi-block path
    # (nq=300 tuples, max_tile_tuples=128 -> tb=128, nq_pad=384, grid=(3,)).
    dim2, nq2, S2 = 64, 300, 4
    label2 = np.array(([-1, 1] + [0] * (S2 - 2)) * nq2, dtype=np.int64)
    x2 = jax.random.normal(jax.random.PRNGKey(1), (dim2, nq2 * S2), dtype=jnp.float32)

    out2 = jax.block_until_ready(
        triplet_loss_pallas(x2, label2, margin=margin, max_tile_tuples=128))
    ref2 = jax.block_until_ready(triplet_loss_ref(x2, label2, margin=margin))
    assert np.allclose(np.asarray(out2), np.asarray(ref2), rtol=1e-4, atol=1e-3), (out2, ref2)

    # Same case with the auto (large) tile and optional bf16 staging of the
    # de-interleaved inputs (compute stays f32) -> loose tolerance.
    out3 = jax.block_until_ready(
        triplet_loss_pallas(x2, label2, margin=margin, staging_dtype=jnp.bfloat16))
    assert np.allclose(np.asarray(out3), np.asarray(ref2), rtol=5e-2, atol=5e-1), (out3, ref2)

    print("KERNEL_OK")
</pallas_src>

<mosaic_0001>
module attributes {stable_mosaic.version = 11 : i64} {
  func.func @kernel(%arg0: i32, %arg1: memref<32x4xf32, #tpu.memory_space<vmem>>, %arg2: memref<32x4xf32, #tpu.memory_space<vmem>>, %arg3: memref<3x32x4xf32, #tpu.memory_space<vmem>>, %arg4: memref<1x4xf32, #tpu.memory_space<vmem>>) attributes {dimension_semantics = [#tpu.dimension_semantics<parallel>], iteration_bounds = array<i64: 1>, scalar_prefetch = 0 : i64, scratch_operands = 0 : i64, tpu.core_type = #tpu.core_type<tc>, window_params = [{transform_indices = @transform_0, window_bounds = array<i64: 32, 4>}, {transform_indices = @transform_1, window_bounds = array<i64: 32, 4>}, {transform_indices = @transform_2, window_bounds = array<i64: 3, 32, 4>}, {transform_indices = @transform_3, window_bounds = array<i64: 1, 4>}]} {
    %c0 = arith.constant 0 : index
    %c0_0 = arith.constant 0 : index
    %0 = vector.load %arg1[%c0, %c0_0] : memref<32x4xf32, #tpu.memory_space<vmem>>, vector<32x4xf32>
    %c0_1 = arith.constant 0 : index
    %c0_2 = arith.constant 0 : index
    %1 = vector.load %arg2[%c0_1, %c0_2] : memref<32x4xf32, #tpu.memory_space<vmem>>, vector<32x4xf32>
    %2 = arith.subf %0, %1 : vector<32x4xf32>
    %3 = arith.mulf %2, %2 : vector<32x4xf32>
    %cst = arith.constant dense<0.000000e+00> : vector<4xf32>
    %4 = vector.multi_reduction <add>, %3, %cst [0] : vector<32x4xf32> to vector<4xf32>
    %5 = vector.shape_cast %4 : vector<4xf32> to vector<1x4xf32>
    %cst_3 = arith.constant 0.000000e+00 : f32
    %6 = vector.broadcast %cst_3 : f32 to vector<1x4xf32>
    %c0_i32 = arith.constant 0 : i32
    %7 = arith.index_cast %c0_i32 : i32 to index
    %c0_4 = arith.constant 0 : index
    %c0_5 = arith.constant 0 : index
    %8 = vector.load %arg3[%7, %c0_4, %c0_5] : memref<3x32x4xf32, #tpu.memory_space<vmem>>, vector<1x32x4xf32>
    %9 = vector.shape_cast %8 : vector<1x32x4xf32> to vector<32x4xf32>
    %10 = arith.subf %0, %9 : vector<32x4xf32>
    %11 = arith.mulf %10, %10 : vector<32x4xf32>
    %cst_6 = arith.constant dense<0.000000e+00> : vector<4xf32>
    %12 = vector.multi_reduction <add>, %11, %cst_6 [0] : vector<32x4xf32> to vector<4xf32>
    %13 = vector.shape_cast %12 : vector<4xf32> to vector<1x4xf32>
    %14 = arith.subf %5, %13 : vector<1x4xf32>
    %cst_7 = arith.constant 1.000000e-01 : f32
    %15 = vector.broadcast %cst_7 : f32 to vector<1x4xf32>
    %16 = arith.addf %14, %15 : vector<1x4xf32>
    %cst_8 = arith.constant 0.000000e+00 : f32
    %17 = vector.broadcast %cst_8 : f32 to vector<1x4xf32>
    %18 = arith.maximumf %16, %17 : vector<1x4xf32>
    %19 = arith.addf %6, %18 : vector<1x4xf32>
    %c1_i32 = arith.constant 1 : i32
    %20 = arith.index_cast %c1_i32 : i32 to index
    %c0_9 = arith.constant 0 : index
    %c0_10 = arith.constant 0 : index
    %21 = vector.load %arg3[%20, %c0_9, %c0_10] : memref<3x32x4xf32, #tpu.memory_space<vmem>>, vector<1x32x4xf32>
    %22 = vector.shape_cast %21 : vector<1x32x4xf32> to vector<32x4xf32>
    %23 = arith.subf %0, %22 : vector<32x4xf32>
    %24 = arith.mulf %23, %23 : vector<32x4xf32>
    %cst_11 = arith.constant dense<0.000000e+00> : vector<4xf32>
    %25 = vector.multi_reduction <add>, %24, %cst_11 [0] : vector<32x4xf32> to vector<4xf32>
    %26 = vector.shape_cast %25 : vector<4xf32> to vector<1x4xf32>
    %27 = arith.subf %5, %26 : vector<1x4xf32>
    %cst_12 = arith.constant 1.000000e-01 : f32
    %28 = vector.broadcast %cst_12 : f32 to vector<1x4xf32>
    %29 = arith.addf %27, %28 : vector<1x4xf32>
    %cst_13 = arith.constant 0.000000e+00 : f32
    %30 = vector.broadcast %cst_13 : f32 to vector<1x4xf32>
    %31 = arith.maximumf %29, %30 : vector<1x4xf32>
    %32 = arith.addf %19, %31 : vector<1x4xf32>
    %c2_i32 = arith.constant 2 : i32
    %33 = arith.index_cast %c2_i32 : i32 to index
    %c0_14 = arith.constant 0 : index
    %c0_15 = arith.constant 0 : index
    %34 = vector.load %arg3[%33, %c0_14, %c0_15] : memref<3x32x4xf32, #tpu.memory_space<vmem>>, vector<1x32x4xf32>
    %35 = vector.shape_cast %34 : vector<1x32x4xf32> to vector<32x4xf32>
    %36 = arith.subf %0, %35 : vector<32x4xf32>
    %37 = arith.mulf %36, %36 : vector<32x4xf32>
    %cst_16 = arith.constant dense<0.000000e+00> : vector<4xf32>
    %38 = vector.multi_reduction <add>, %37, %cst_16 [0] : vector<32x4xf32> to vector<4xf32>
    %39 = vector.shape_cast %38 : vector<4xf32> to vector<1x4xf32>
    %40 = arith.subf %5, %39 : vector<1x4xf32>
    %cst_17 = arith.constant 1.000000e-01 : f32
    %41 = vector.broadcast %cst_17 : f32 to vector<1x4xf32>
    %42 = arith.addf %40, %41 : vector<1x4xf32>
    %cst_18 = arith.constant 0.000000e+00 : f32
    %43 = vector.broadcast %cst_18 : f32 to vector<1x4xf32>
    %44 = arith.maximumf %42, %43 : vector<1x4xf32>
    %45 = arith.addf %32, %44 : vector<1x4xf32>
    %c3_i32 = arith.constant 3 : i32
    %c0_19 = arith.constant 0 : index
    %c0_20 = arith.constant 0 : index
    %46 = vector.load %arg4[%c0_19, %c0_20] : memref<1x4xf32, #tpu.memory_space<vmem>>, vector<1x4xf32>
    tpu.vector_store %arg4[%c0_19, %c0_20], %45 {strides = array<i32>} : memref<1x4xf32, #tpu.memory_space<vmem>>, vector<1x4xf32>,
    return
  }
  func.func @transform_0(%arg0: i32) -> (i32, i32) {
    %c0_i32 = arith.constant 0 : i32
    %c0_i32_0 = arith.constant 0 : i32
    return %c0_i32, %arg0 : i32, i32
  }
  func.func @transform_1(%arg0: i32) -> (i32, i32) {
    %c0_i32 = arith.constant 0 : i32
    %c0_i32_0 = arith.constant 0 : i32
    return %c0_i32, %arg0 : i32, i32
  }
  func.func @transform_2(%arg0: i32) -> (i32, i32, i32) {
    %c0_i32 = arith.constant 0 : i32
    %c0_i32_0 = arith.constant 0 : i32
    %c0_i32_1 = arith.constant 0 : i32
    return %c0_i32, %c0_i32_0, %arg0 : i32, i32, i32
  }
  func.func @transform_3(%arg0: i32) -> (i32, i32) {
    %c0_i32 = arith.constant 0 : i32
    %c0_i32_0 = arith.constant 0 : i32
    return %c0_i32, %arg0 : i32, i32
  }
}

</mosaic_0001>

<bundles_post_ra>
// kernel: tpu_custom_call.1
= control target key start
LH: loop header
LB: loop body
LE: loop exit
PB: predicated region body
PF: predicated region fallthrough
CT: control target
= control target key end

     0   :  { %vm31_vm0 = vcmask 31744   ;;  %s287_s0 = inlined_call_operand.vmem [shape: f32[32,4], index: 0, kind: input, shape index: {}]   ;;  %s288_s1 = inlined_call_operand.vmem [shape: f32[32,4], index: 1, kind: input, shape index: {}]   ;;  %s289_s2 = inlined_call_operand.vmem [shape: f32[3,32,4], index: 2, kind: input, shape index: {}]   ;;  %s290_s3 = inlined_call_operand.hbm [shape: f32[1,4], index: 3, kind: output, shape index: {}]  }
   0x1   :  { %v15_v0 = vld [vmem:[%s287_s0] sm:$0xff]  ;;  %v16_v1 = vld [vmem:[%s287_s0 + $0x8] sm:$0xff]  ;;  %v17_v2 = vld [vmem:[%s287_s0 + $0x10] sm:$0xff] }
   0x2   :  { %v214_v3 = vld [vmem:[%s287_s0 + $0x18] sm:$0xff]  ;;  %v19_v4 = vld [vmem:[%s288_s1] sm:$0xff]  ;;  %v20_v5 = vld [vmem:[%s288_s1 + $0x8] sm:$0xff] }
   0x3   :  { %v21_v6 = vld [vmem:[%s288_s1 + $0x10] sm:$0xff]  ;;  %v22_v7 = vld [vmem:[%s288_s1 + $0x18] sm:$0xff]  ;;  %v23_v8 = vsub.f32 %v15_v0, %v19_v4  ;;  %v24_v9 = vsub.f32 %v16_v1, %v20_v5  ;;  %v45_v10 = vld [vmem:[%s289_s2] sm:$0xff] }
   0x4   :  { %v25_v11 = vsub.f32 %v17_v2, %v21_v6  ;;  %v26_v12 = vsub.f32 %v214_v3, %v22_v7  ;;  %v46_v13 = vld [vmem:[%s289_s2 + $0x8] sm:$0xff]  ;;  %v47_v14 = vld [vmem:[%s289_s2 + $0x10] sm:$0xff]  ;;  %v48_v15 = vld [vmem:[%s289_s2 + $0x18] sm:$0xff]  ;;  %v49_v16 = vsub.f32 %v15_v0, %v45_v10 }
   0x5   :  { %v27_v17 = vmul.f32 %v23_v8, %v23_v8  ;;  %v28_v18 = vmul.f32 %v24_v9, %v24_v9  ;;  %v50_v19 = vsub.f32 %v16_v1, %v46_v13  ;;  %v51_v20 = vsub.f32 %v17_v2, %v47_v14  ;;  %v150_v25 = vld [vmem:[%s289_s2 + $0x20] sm:$0xff]  ;;  %v151_v30 = vld [vmem:[%s289_s2 + $0x28] sm:$0xff] }
   0x6   :  { %v29_v21 = vmul.f32 %v25_v11, %v25_v11  ;;  %v30_v22 = vmul.f32 %v26_v12, %v26_v12  ;;  %v52_v23 = vsub.f32 %v214_v3, %v48_v15  ;;  %v53_v24 = vmul.f32 %v49_v16, %v49_v16 }
   0x7   :  { %v32_v26 = vsel %vm31_vm0, %v27_v17, 0.0  ;;  %v33_v27 = vsel %vm31_vm0, %v28_v18, 0.0  ;;  %v54_v28 = vmul.f32 %v50_v19, %v50_v19  ;;  %v55_v29 = vmul.f32 %v51_v20, %v51_v20 }
   0x8   :  { %8 = vsyncpa [#allocation3], 0  ;;  %v34_v31 = vadd.f32 %v33_v27, %v32_v26  ;;  %v35_v32 = vsel %vm31_vm0, %v29_v21, 0.0  ;;  %v37_v33 = vsel %vm31_vm0, %v30_v22, 0.0  ;;  %v56_v34 = vmul.f32 %v52_v23, %v52_v23  ;;  %v152_v35 = vld [vmem:[%s289_s2 + $0x30] sm:$0xff]  ;;  %v153_v36 = vld [vmem:[%s289_s2 + $0x38] sm:$0xff] }
   0x9   :  { %v154_v37 = vld [vmem:[%s289_s2 + $0x40] sm:$0xff]  ;;  %v57_v38 = vsel %vm31_vm0, %v53_v24, 0.0  ;;  %v58_v39 = vsel %vm31_vm0, %v54_v28, 0.0  ;;  %v60_v40 = vsel %vm31_vm0, %v55_v29, 0.0  ;;  %v79_v41 = vsub.f32 %v15_v0, %v150_v25  ;;  %v155_v42 = vld [vmem:[%s289_s2 + $0x48] sm:$0xff]  ;;  %v156_v47 = vld [vmem:[%s289_s2 + $0x50] sm:$0xff] }
   0xa   :  { %v36_v43 = vadd.f32 %v35_v32, %v34_v31  ;;  %v59_v44 = vadd.f32 %v58_v39, %v57_v38  ;;  %v62_v45 = vsel %vm31_vm0, %v56_v34, 0.0  ;;  %v80_v46 = vsub.f32 %v16_v1, %v151_v30  ;;  %v157_v51 = vld [vmem:[%s289_s2 + $0x58] sm:$0xff]  ;;  %s181_s2 = smov [#allocation2]  }
   0xb   :  { %v81_v48 = vsub.f32 %v17_v2, %v152_v35  ;;  %v82_v49 = vsub.f32 %v214_v3, %v153_v36  ;;  %v83_v50 = vmul.f32 %v79_v41, %v79_v41  ;;  %v109_v52 = vsub.f32 %v15_v0, %v154_v37  ;;  %s142_s23 = sshll.u32 %s181_s2, 4  ;;  %s143_s23 = int_to_ptr.vmem [resolvable:$true] %s142_s23 }
   0xc   :  { %v38_v53 = vadd.f32 %v37_v33, %v36_v43  ;;  %v61_v54 = vadd.f32 %v60_v40, %v59_v44  ;;  %v84_v55 = vmul.f32 %v80_v46, %v80_v46  ;;  %v110_v56 = vsub.f32 %v16_v1, %v155_v42  ;;  %s159_s24 = scalar_lea.vmem %s143_s23, 16  ;;  %s163_s25 = scalar_lea.vmem %s143_s23, 32 }
   0xd   :  { %v85_v57 = vmul.f32 %v81_v48, %v81_v48  ;;  %v86_v58 = vmul.f32 %v82_v49, %v82_v49  ;;  %v87_v59 = vsel %vm31_vm0, %v83_v50, 0.0  ;;  %v111_v60 = vsub.f32 %v17_v2, %v156_v47  ;;  %p160_p0 = scmp.ne.s32.totalorder %s143_s23, %s159_s24  ;;  %p164_p1 = scmp.lt.s32.totalorder %s143_s23, %s143_s23 }
   0xe   :  { %v39_v61 = vrot.slane %v38_v53, 4  ;;  %v63_v62 = vadd.f32 %v62_v45, %v61_v54  ;;  %v88_v63 = vsel %vm31_vm0, %v84_v55, 0.0  ;;  %v112_v4 = vsub.f32 %v214_v3, %v157_v51  ;;  %p165_p2 = scmp.lt.s32.totalorder %s163_s25, %s159_s24 }
   0xf   :  { %v89_v5 = vadd.f32 %v88_v63, %v87_v59  ;;  %v90_v6 = vsel %vm31_vm0, %v85_v57, 0.0  ;;  %v92_v0 = vsel %vm31_vm0, %v86_v58, 0.0  ;;  %v113_v7 = vmul.f32 %v109_v52, %v109_v52 }
  0x10   :  { %v40_v8 = vadd.f32 %v39_v61, %v38_v53  ;;  %v64_v9 = vrot.slane %v63_v62, 4  ;;  %v114_v1 = vmul.f32 %v110_v56, %v110_v56  ;;  %v115_v10 = vmul.f32 %v111_v60, %v111_v60  ;;  %p166_p3 = por %p165_p2, %p164_p1 }
  0x11   :  { %v91_v11 = vadd.f32 %v90_v6, %v89_v5  ;;  %v116_v12 = vmul.f32 %v112_v4, %v112_v4  ;;  %v117_v2 = vsel %vm31_vm0, %v113_v7, 0.0  ;;  %vm134_vm1 = vcmask 24576  }
  0x12   :  { %v41_v13 = vrot.slane %v40_v8, 2  ;;  %v65_v14 = vadd.f32 %v64_v9, %v63_v62  ;;  %v118_v15 = vsel %vm31_vm0, %v114_v1, 0.0  ;;  %v120_v3 = vsel %vm31_vm0, %v115_v10, 0.0  ;;  %p167_p4 = pnand %p166_p3, %p160_p0 }
  0x13   :  { %v93_v16 = vadd.f32 %v92_v0, %v91_v11  ;;  %v119_v17 = vadd.f32 %v118_v15, %v117_v2  ;;  %v122_v20 = vsel %vm31_vm0, %v116_v12, 0.0 }
  0x14   :  { %v42_v18 = vadd.f32 %v41_v13, %v40_v8  ;;  %v66_v19 = vrot.slane %v65_v14, 2 }
  0x15   :  { %v94_v21 = vrot.slane %v93_v16, 4  ;;  %v121_v22 = vadd.f32 %v120_v3, %v119_v17 }
  0x16   :  { %v43_v23 = vrot.slane %v42_v18, 1  ;;  %v67_v24 = vadd.f32 %v66_v19, %v65_v14 }
  0x17   :  { %v95_v25 = vadd.f32 %v94_v21, %v93_v16  ;;  %v123_v26 = vadd.f32 %v122_v20, %v121_v22 }
  0x18   :  { %v44_v27 = vadd.f32 %v43_v23, %v42_v18  ;;  %v68_v28 = vrot.slane %v67_v24, 1 }
  0x19   :  { %v96_v29 = vrot.slane %v95_v25, 2  ;;  %v124_v30 = vrot.slane %v123_v26, 4 }
  0x1a   :  { %v69_v31 = vadd.f32 %v68_v28, %v67_v24 }
  0x1b   :  { %v97_v32 = vadd.f32 %v96_v29, %v95_v25  ;;  %v125_v33 = vadd.f32 %v124_v30, %v123_v26 }
  0x1c   :  { %v70_v34 = vsub.f32 %v44_v27, %v69_v31 }
  0x1d   :  { %v98_v35 = vrot.slane %v97_v32, 1  ;;  %v126_v36 = vrot.slane %v125_v33, 2 }
  0x1e   :  { %v71_v37 = vadd.f32 0.1, %v70_v34 }
  0x1f   :  { %v99_v38 = vadd.f32 %v98_v35, %v97_v32  ;;  %v127_v39 = vadd.f32 %v126_v36, %v125_v33 }
  0x20   :  { %v72_v42 = vmax.f32 %v71_v37, 0.0 }
  0x21   :  { %v100_v40 = vsub.f32 %v44_v27, %v99_v38  ;;  %v128_v41 = vrot.slane %v127_v39, 1 }
  0x23   :  { %v101_v43 = vadd.f32 0.1, %v100_v40  ;;  %v129_v44 = vadd.f32 %v128_v41, %v127_v39 }
  0x25   :  { %v102_v45 = vmax.f32 %v101_v43, 0.0  ;;  %v130_v46 = vsub.f32 %v44_v27, %v129_v44 }
  0x27   :  { %v103_v47 = vadd.f32 %v102_v45, %v72_v42  ;;  %v131_v48 = vadd.f32 0.1, %v130_v46 }
  0x29   :  { %v132_v49 = vmax.f32 %v131_v48, 0.0 }
  0x2b   :  { %v133_v50 = vadd.f32 %v132_v49, %v103_v47 }
  0x2d   :  { %135 = vst.msk [vmem:[#allocation2] sm:$0x1] %vm134_vm1, %v133_v50 }
  0x2e   :  { %170 = shalt.err (!%p167_p4)
}
  0x2f   :  { %145 = dma.vmem_to_hbm [thread:$0]  %s143_s23, 16, %s290_s3, [#allocation3]  }
  0x30   :  { %179 = dma.done.wait [#allocation3], 16  }
  0x31   :  { %180 = vsyncadd [#allocation3], 4294967280 }
  0x32   :  { %149 = vsyncpa [#allocation3], 1 }

</bundles_post_ra>
